<compile_context>
chip_gen: v7x
topology: tpu7x:2x2x1
jax: 0.10.0
libtpu: 0.0.40
codegen_flags: <defaults>
</compile_context>

<pallas_src>
import functools
import math

import jax
import jax.numpy as jnp
from jax.experimental import pallas as pl
from jax.experimental.pallas import tpu as pltpu

LANES = 128          # TPU lane width (fast axis)
SUBLANES = 8         # sublane granularity for f32
ROW_BLOCK_MAX = 1024 # sublane-rows per tile (512 KB f32 input tile)


def _awing_kernel(preds_ref, targets_ref, out_ref, *,
                  alpha, omega, epsilon, theta, ln_r, eps_over_theta,
                  omega_over_eps):
    p = preds_ref[...]
    t = targets_ref[...]

    diff = jnp.abs(t - p)
    case1 = diff < theta

    # Case 1: omega * log1p((diff / epsilon) ** alpha)   (diff >= 0 -> safe pow)
    loss1 = omega * jnp.log1p(jnp.power(diff * (1.0 / epsilon), alpha))

    # Case 2: A * diff - C, with A/C depending on the target value.
    exp_t = alpha - t                          # (alpha - y)
    # (theta/eps)^(alpha - y); log of the scalar base folded at trace time.
    pow_r = jnp.exp(exp_t * ln_r)
    # (theta/eps)^(alpha - y - 1) == pow_r * (eps/theta); avoids a 2nd pow.
    pow_r_m1 = pow_r * eps_over_theta

    inv = 1.0 / (1.0 + pow_r)                  # exact: tolerance is 1e-5
    A = omega_over_eps * inv * exp_t * pow_r_m1
    C = theta * A - omega * jnp.log1p(pow_r)
    loss2 = A * diff - C

    out_ref[...] = jnp.where(case1, loss1, loss2)


def awing_loss(preds, targets, *, alpha=2.1, omega=14.0, epsilon=1.0, theta=0.5):
    """Elementwise AWing loss matrix, same shape as preds (any shape)."""
    assert preds.shape == targets.shape
    orig_shape = preds.shape
    dtype = jnp.promote_types(preds.dtype, jnp.float32)

    p_flat = preds.astype(dtype).reshape(-1)
    t_flat = targets.astype(dtype).reshape(-1)
    n = p_flat.shape[0]

    # Choose a row-block: multiple of SUBLANES, capped at ROW_BLOCK_MAX.
    rows_raw = -(-n // LANES)                                   # ceil(n / 128)
    row_block = min(ROW_BLOCK_MAX,
                    ((rows_raw + SUBLANES - 1) // SUBLANES) * SUBLANES)
    # Pad rows up to a multiple of row_block so the grid divides evenly.
    rows = ((rows_raw + row_block - 1) // row_block) * row_block
    total = rows * LANES
    n_pad = total - n
    if n_pad:
        p_flat = jnp.pad(p_flat, (0, n_pad))
        t_flat = jnp.pad(t_flat, (0, n_pad))
    p2 = p_flat.reshape(rows, LANES)
    t2 = t_flat.reshape(rows, LANES)

    kernel = functools.partial(
        _awing_kernel,
        alpha=float(alpha), omega=float(omega),
        epsilon=float(epsilon), theta=float(theta),
        ln_r=math.log(theta / epsilon),
        eps_over_theta=float(epsilon / theta),
        omega_over_eps=float(omega / epsilon),
    )

    grid = (rows // row_block,)
    n_elems = total
    cost = pl.CostEstimate(
        flops=15 * n_elems,
        transcendentals=5 * n_elems,
        bytes_accessed=12 * n_elems,  # 2 inputs + 1 output, f32
    )

    out2 = pl.pallas_call(
        kernel,
        out_shape=jax.ShapeDtypeStruct((rows, LANES), dtype),
        grid_spec=pltpu.PrefetchScalarGridSpec(
            num_scalar_prefetch=0,
            grid=grid,
            in_specs=[
                pl.BlockSpec((row_block, LANES), lambda i: (i, 0)),
                pl.BlockSpec((row_block, LANES), lambda i: (i, 0)),
            ],
            out_specs=pl.BlockSpec((row_block, LANES), lambda i: (i, 0)),
        ),
        compiler_params=pltpu.CompilerParams(
            dimension_semantics=("parallel",),
        ),
        cost_estimate=cost,
    )(p2, t2)

    out_flat = out2.reshape(-1)[:n]
    return out_flat.reshape(orig_shape)


def _awing_loss_ref(preds, targets, alpha=2.1, omega=14.0, epsilon=1.0, theta=0.5):
    """Pure-JAX reference mirroring the PyTorch forward."""
    preds = preds.astype(jnp.float32)
    targets = targets.astype(jnp.float32)
    diff = jnp.abs(targets - preds)
    case1 = diff < theta
    loss1 = omega * jnp.log1p((diff / epsilon) ** alpha)
    A = (omega * (1.0 / (1.0 + (theta / epsilon) ** (alpha - targets)))
         * (alpha - targets) * (theta / epsilon) ** (alpha - targets - 1.0)
         * (1.0 / epsilon))
    C = theta * A - omega * jnp.log1p((theta / epsilon) ** (alpha - targets))
    loss2 = A * diff - C
    return jnp.where(case1, loss1, loss2)


if __name__ == "__main__":
    key = jax.random.PRNGKey(0)
    k1, k2 = jax.random.split(key)
    # Heatmap-style inputs: B=2, C=4, H=W=16 (NCHW), values in [0, 1].
    preds = jax.random.uniform(k1, (2, 4, 16, 16), dtype=jnp.float32)
    targets = jax.random.uniform(k2, (2, 4, 16, 16), dtype=jnp.float32)

    out = awing_loss(preds, targets)
    out = jax.block_until_ready(out)

    ref = _awing_loss_ref(preds, targets)
    assert out.shape == preds.shape
    assert jnp.allclose(out, ref, atol=1e-5, rtol=1e-5), "mismatch vs reference"

    # Spot-check branch boundaries: diff == 0 and diff == theta.
    p_edge = jnp.array([[0.3, 0.3], [0.2, 0.9]], dtype=jnp.float32)
    t_edge = jnp.array([[0.3, 0.8], [0.2, 0.4]], dtype=jnp.float32)
    out_edge = jax.block_until_ready(awing_loss(p_edge, t_edge))
    ref_edge = _awing_loss_ref(p_edge, t_edge)
    assert jnp.allclose(out_edge, ref_edge, atol=1e-5, rtol=1e-5), "edge mismatch"

    print("KERNEL_OK")
</pallas_src>

<mosaic_0001>
module attributes {stable_mosaic.version = 11 : i64} {
  func.func @_awing_kernel(%arg0: i32, %arg1: memref<16x128xf32, #tpu.memory_space<vmem>>, %arg2: memref<16x128xf32, #tpu.memory_space<vmem>>, %arg3: memref<16x128xf32, #tpu.memory_space<vmem>>) attributes {dimension_semantics = [#tpu.dimension_semantics<parallel>], iteration_bounds = array<i64: 1>, scalar_prefetch = 0 : i64, scratch_operands = 0 : i64, tpu.core_type = #tpu.core_type<tc>, window_params = [{transform_indices = @transform_0, window_bounds = array<i64: 16, 128>}, {transform_indices = @transform_1, window_bounds = array<i64: 16, 128>}, {transform_indices = @transform_2, window_bounds = array<i64: 16, 128>}]} {
    %c0 = arith.constant 0 : index
    %c0_0 = arith.constant 0 : index
    %0 = vector.load %arg1[%c0, %c0_0] : memref<16x128xf32, #tpu.memory_space<vmem>>, vector<16x128xf32>
    %c0_1 = arith.constant 0 : index
    %c0_2 = arith.constant 0 : index
    %1 = vector.load %arg2[%c0_1, %c0_2] : memref<16x128xf32, #tpu.memory_space<vmem>>, vector<16x128xf32>
    %2 = arith.subf %1, %0 : vector<16x128xf32>
    %3 = math.absf %2 : vector<16x128xf32>
    %cst = arith.constant 5.000000e-01 : f32
    %4 = vector.broadcast %cst : f32 to vector<16x128xf32>
    %5 = arith.cmpf olt, %3, %4 : vector<16x128xf32>
    %cst_3 = arith.constant 1.000000e+00 : f32
    %6 = vector.broadcast %cst_3 : f32 to vector<16x128xf32>
    %7 = arith.mulf %3, %6 : vector<16x128xf32>
    %cst_4 = arith.constant 2.100000e+00 : f32
    %8 = vector.broadcast %cst_4 : f32 to vector<16x128xf32>
    %9 = math.powf %7, %8 : vector<16x128xf32>
    %10 = math.log1p %9 : vector<16x128xf32>
    %cst_5 = arith.constant 1.400000e+01 : f32
    %11 = vector.broadcast %cst_5 : f32 to vector<16x128xf32>
    %12 = arith.mulf %11, %10 : vector<16x128xf32>
    %cst_6 = arith.constant 2.100000e+00 : f32
    %13 = vector.broadcast %cst_6 : f32 to vector<16x128xf32>
    %14 = arith.subf %13, %1 : vector<16x128xf32>
    %cst_7 = arith.constant -0.693147182 : f32
    %15 = vector.broadcast %cst_7 : f32 to vector<16x128xf32>
    %16 = arith.mulf %14, %15 : vector<16x128xf32>
    %17 = math.exp %16 : vector<16x128xf32>
    %cst_8 = arith.constant 2.000000e+00 : f32
    %18 = vector.broadcast %cst_8 : f32 to vector<16x128xf32>
    %19 = arith.mulf %17, %18 : vector<16x128xf32>
    %cst_9 = arith.constant 1.000000e+00 : f32
    %20 = vector.broadcast %cst_9 : f32 to vector<16x128xf32>
    %21 = arith.addf %20, %17 : vector<16x128xf32>
    %cst_10 = arith.constant 1.000000e+00 : f32
    %22 = vector.broadcast %cst_10 : f32 to vector<16x128xf32>
    %23 = arith.divf %22, %21 : vector<16x128xf32>
    %cst_11 = arith.constant 1.400000e+01 : f32
    %24 = vector.broadcast %cst_11 : f32 to vector<16x128xf32>
    %25 = arith.mulf %24, %23 : vector<16x128xf32>
    %26 = arith.mulf %25, %14 : vector<16x128xf32>
    %27 = arith.mulf %26, %19 : vector<16x128xf32>
    %cst_12 = arith.constant 5.000000e-01 : f32
    %28 = vector.broadcast %cst_12 : f32 to vector<16x128xf32>
    %29 = arith.mulf %28, %27 : vector<16x128xf32>
    %30 = math.log1p %17 : vector<16x128xf32>
    %cst_13 = arith.constant 1.400000e+01 : f32
    %31 = vector.broadcast %cst_13 : f32 to vector<16x128xf32>
    %32 = arith.mulf %31, %30 : vector<16x128xf32>
    %33 = arith.subf %29, %32 : vector<16x128xf32>
    %34 = arith.mulf %27, %3 : vector<16x128xf32>
    %35 = arith.subf %34, %33 : vector<16x128xf32>
    %36 = arith.select %5, %12, %35 : vector<16x128xi1>, vector<16x128xf32>
    %c0_14 = arith.constant 0 : index
    %c0_15 = arith.constant 0 : index
    %37 = vector.load %arg3[%c0_14, %c0_15] : memref<16x128xf32, #tpu.memory_space<vmem>>, vector<16x128xf32>
    tpu.vector_store %arg3[%c0_14, %c0_15], %36 {strides = array<i32>} : memref<16x128xf32, #tpu.memory_space<vmem>>, vector<16x128xf32>,
    return
  }
  func.func @transform_0(%arg0: i32) -> (i32, i32) {
    %c0_i32 = arith.constant 0 : i32
    %c0_i32_0 = arith.constant 0 : i32
    return %arg0, %c0_i32 : i32, i32
  }
  func.func @transform_1(%arg0: i32) -> (i32, i32) {
    %c0_i32 = arith.constant 0 : i32
    %c0_i32_0 = arith.constant 0 : i32
    return %arg0, %c0_i32 : i32, i32
  }
  func.func @transform_2(%arg0: i32) -> (i32, i32) {
    %c0_i32 = arith.constant 0 : i32
    %c0_i32_0 = arith.constant 0 : i32
    return %arg0, %c0_i32 : i32, i32
  }
}

</mosaic_0001>

<bundles_post_ra>
// kernel: tpu_custom_call.1
= control target key start
LH: loop header
LB: loop body
LE: loop exit
PB: predicated region body
PF: predicated region fallthrough
CT: control target
= control target key end

     0   :  { %7 = vsyncpa [#allocation3], 0  ;;  %s407_s0 = inlined_call_operand.hbm [shape: f32[16,128], index: 0, kind: input, shape index: {}]   ;;  %s408_s1 = inlined_call_operand.hbm [shape: f32[16,128], index: 1, kind: input, shape index: {}]   ;;  %s409_s2 = inlined_call_operand.hbm [shape: f32[16,128], index: 2, kind: output, shape index: {}]  }
   0x1   :  { %8 = vsyncpa [#allocation6], 0 }
   0x2   :  { %9 = vsyncpa [#allocation4], 0  ;;  %s295_s9 = smov [#allocation2]   ;;  %s223_s13 = scalar_lea.hbm %s407_s0, 256 }
   0x3   :  { %s15_s10 = sshll.u32 %s295_s9, 4  ;;  %p224_p0 = scmp.ne.s32.totalorder %s407_s0, %s223_s13  ;;  %s16_s10 = int_to_ptr.vmem [resolvable:$true] %s15_s10 }
   0x4   :  { %p227_p1 = scmp.lt.u32.totalorder %s223_s13, %s407_s0 }
   0x6   :  { %p229_p2 = pnand %p227_p1, %p224_p0 }
   0x8   :  { %232 = shalt.err (!%p229_p2)
}
   0x9   :  { %s233_s18 = scalar_lea.vmem %s16_s10, 256  ;;  %p238_p4 = scmp.lt.s32.totalorder %s16_s10, %s16_s10 }
   0xa   :  { %p234_p3 = scmp.ne.s32.totalorder %s16_s10, %s233_s18  ;;  %p239_p5 = scmp.lt.s32.totalorder %s233_s18, %s233_s18 }
   0xc   :  { %p240_p6 = por %p239_p5, %p238_p4 }
   0xe   :  { %p241_p7 = pnand %p240_p6, %p234_p3 }
  0x10   :  { %244 = shalt.err (!%p241_p7)
}
  0x11   :  { %s296_s19 = smov 128   ;;  %s297_s20 = smov 8  }
  0x12   :  { %21 = dma.hbm_to_vmem [thread:$0]  %s407_s0, 256, %s16_s10, [#allocation3], %s296_s19, %s296_s19, %s297_s20  }
  0x13   :  { %s298_s23 = smov [#allocation5]   ;;  %s245_s27 = scalar_lea.hbm %s408_s1, 256 }
  0x14   :  { %s27_s24 = sshll.u32 %s298_s23, 4  ;;  %p246_p8 = scmp.ne.s32.totalorder %s408_s1, %s245_s27  ;;  %s28_s24 = int_to_ptr.vmem [resolvable:$true] %s27_s24 }
  0x15   :  { %p249_p9 = scmp.lt.u32.totalorder %s245_s27, %s408_s1 }
  0x17   :  { %p251_p10 = pnand %p249_p9, %p246_p8 }
  0x19   :  { %254 = shalt.err (!%p251_p10)
}
  0x1a   :  { %s255_s4 = scalar_lea.vmem %s28_s24, 256  ;;  %p260_p12 = scmp.lt.s32.totalorder %s28_s24, %s28_s24 }
  0x1b   :  { %p256_p11 = scmp.ne.s32.totalorder %s28_s24, %s255_s4  ;;  %p261_p13 = scmp.lt.s32.totalorder %s255_s4, %s255_s4 }
  0x1d   :  { %p262_p0 = por %p261_p13, %p260_p12 }
  0x1f   :  { %p263_p1 = pnand %p262_p0, %p256_p11 }
  0x21   :  { %266 = shalt.err (!%p263_p1)
}
  0x22   :  { %33 = dma.hbm_to_vmem [thread:$0]  %s408_s1, 256, %s28_s24, [#allocation6], %s296_s19, %s296_s19, %s297_s20  }
  0x23   :  { %289 = dma.done.wait [#allocation3], 256  }
  0x24   :  { %290 = vsyncadd [#allocation3], 4294967040 }
  0x25   :  { %291 = dma.done.wait [#allocation6], 256  }
  0x26   :  { %292 = vsyncadd [#allocation6], 4294967040  ;;  %v40_v0 = vld [vmem:[#allocation2] sm:$0xff]  ;;  %v345_v1 = vld [vmem:[#allocation5] sm:$0xff]  ;;  %s299_s1 = smov [#allocation7]  }
  0x27   :  { %v41_v2 = vld [vmem:[#allocation2 + $0x8] sm:$0xff]  ;;  %v44_v3 = vsub.f32 %v345_v1, %v40_v0  ;;  %v72_v4 = vsub.f32 2.1, %v345_v1  ;;  %v349_v5 = vld [vmem:[#allocation5 + $0x8] sm:$0xff]  ;;  %s131_s6 = sshll.u32 %s299_s1, 4  ;;  %s132_s6 = int_to_ptr.vmem [resolvable:$true] %s131_s6 }
  0x28   :  { %v45_v6 = vsub.f32 %v349_v5, %v41_v2  ;;  %v73_v7 = vsub.f32 2.1, %v349_v5  ;;  %s267_s7 = scalar_lea.vmem %s132_s6, 256  ;;  %p272_p3 = scmp.lt.s32.totalorder %s132_s6, %s132_s6 }
  0x29   :  { %v353_v8 = vand.u32 2147483647, %v44_v3  ;;  %v74_v9 = vmul.f32 -0.6931472, %v72_v4  ;;  %p268_p2 = scmp.ne.s32.totalorder %s132_s6, %s267_s7  ;;  %p273_p4 = scmp.lt.s32.totalorder %s267_s7, %s267_s7 }
  0x2a   :  { %v355_v10 = vand.u32 2147483647, %v45_v6  ;;  %v75_v11 = vmul.f32 -0.6931472, %v73_v7 }
  0x2b   :  { %199 = vlog2.f32 %v353_v8  ;;  %v76_v12 = vmul.f32 1.442695, %v74_v9  ;;  %vm152_vm0 = vcmp.lt.f32.partialorder %v353_v8, 0  ;;  %vm153_vm1 = vcmp.eq.f32.partialorder %v353_v8, 0  ;;  %p274_p5 = por %p273_p4, %p272_p3 }
  0x2c   :  { %201 = vlog2.f32 %v355_v10  ;;  %v78_v13 = vmul.f32 1.442695, %v75_v11  ;;  %vm154_vm2 = vcmp.eq.f32.partialorder %v353_v8, 1065353216  ;;  %vm156_vm3 = vcmp.eq.f32.partialorder %v353_v8, 2139095040 }
  0x2d   :  { %203 = vpow2.f32 %v76_v12  ;;  %vm177_vm4 = vcmp.lt.f32.partialorder %v355_v10, 0  ;;  %vm164_vm5 = vcmp.ne.f32.partialorder %v353_v8, %v353_v8  ;;  %vm178_vm6 = vcmp.eq.f32.partialorder %v355_v10, 0  ;;  %p275_p6 = pnand %p274_p5, %p268_p2 }
  0x2e   :  { %205 = vpow2.f32 %v78_v13  ;;  %vm179_vm7 = vcmp.eq.f32.partialorder %v355_v10, 1065353216  ;;  %vm181_vm8 = vcmp.eq.f32.partialorder %v355_v10, 2139095040  ;;  %vm189_vm9 = vcmp.ne.f32.partialorder %v355_v10, %v355_v10 }
  0x2f   :  { %vm48_vm13 = vcmp.lt.f32.partialorder %v353_v8, 0.5  ;;  %vm49_vm15 = vcmp.lt.f32.partialorder %v355_v10, 0.5 }
  0x35   :  { %v200_v14 = vpop.eup %199 }
  0x36   :  { %v150_v15 = vmul.f32 2.1, %v200_v14  ;;  %v202_v16 = vpop.eup %201 }
  0x37   :  { %v204_v17 = vpop.eup %203  ;;  %v175_v18 = vmul.f32 2.1, %v202_v16 }
  0x38   :  { %207 = vpow2.f32 %v150_v15  ;;  %v82_v19 = vadd.f32 1.0, %v204_v17  ;;  %v206_v20 = vpop.eup %205  ;;  %v99_v22 = vmul.f32 -0.5, %v204_v17  ;;  %v102_v29 = vand.u32 2147483647, %v204_v17 }
  0x39   :  { %209 = vpow2.f32 %v175_v18  ;;  %v83_v21 = vadd.f32 1.0, %v206_v20  ;;  %v108_v24 = vmul.f32 -0.5, %v206_v20  ;;  %v80_v32 = vmul.f32 2.0, %v204_v17 }
  0x3a   :  { %211 = vrcp.f32 %v82_v19  ;;  %v100_v26 = vadd.f32 1.0, %v99_v22  ;;  %vm375_vm10 = vcmp.lt.f32.partialorder %v102_v29, 0.0004427343  ;;  %v111_v47 = vand.u32 2147483647, %v206_v20 }
  0x3b   :  { %213 = vlog2.f32 %v82_v19  ;;  %v109_v38 = vadd.f32 1.0, %v108_v24  ;;  %v81_v50 = vmul.f32 2.0, %v206_v20 }
  0x3c   :  { %215 = vrcp.f32 %v83_v21  ;;  %v101_v41 = vmul.f32 %v204_v17, %v100_v26  ;;  %vm112_vm11 = vcmp.lt.f32.partialorder %v111_v47, 0.0004427343 }
  0x3d   :  { %217 = vlog2.f32 %v83_v21  ;;  %v110_v54 = vmul.f32 %v206_v20, %v109_v38 }
  0x42   :  { %v208_v23 = vpop.eup %207 }
  0x43   :  { %v157_v25 = vsel %vm152_vm0, 2143289344, %v208_v23  ;;  %v210_v27 = vpop.eup %209 }
  0x44   :  { %v158_v28 = vsel %vm153_vm1, 0, %v157_v25  ;;  %v212_v30 = vpop.eup %211  ;;  %v182_v33 = vsel %vm177_vm4, 2143289344, %v210_v27 }
  0x45   :  { %v163_v31 = vsel %vm156_vm3, 2139095040, %v158_v28  ;;  %v214_v34 = vpop.eup %213  ;;  %v88_v36 = vmul.f32 14.0, %v212_v30  ;;  %v183_v37 = vsel %vm178_vm6, 0, %v182_v33 }
  0x46   :  { %v167_v35 = vsel %vm164_vm5, 2143289344, %v163_v31  ;;  %v98_v40 = vmul.f32 0.6931472, %v214_v34  ;;  %v188_v42 = vsel %vm181_vm8, 2139095040, %v183_v37  ;;  %v216_v43 = vpop.eup %215 }
  0x47   :  { %v168_v39 = vsel %vm154_vm2, 1065353216, %v167_v35  ;;  %v90_v45 = vmul.f32 %v88_v36, %v72_v4  ;;  %v218_v48 = vpop.eup %217  ;;  %v192_v49 = vsel %vm189_vm9, 2143289344, %v188_v42  ;;  %v89_v51 = vmul.f32 14.0, %v216_v43 }
  0x48   :  { %v52_v44 = vadd.f32 1.0, %v168_v39  ;;  %v55_v52 = vmul.f32 -0.5, %v168_v39  ;;  %v104_v55 = vsel %vm375_vm10, %v101_v41, %v98_v40  ;;  %v193_v56 = vsel %vm179_vm7, 1065353216, %v192_v49 }
  0x49   :  { %v92_v53 = vmul.f32 %v90_v45, %v80_v32  ;;  %v91_v57 = vmul.f32 %v89_v51, %v73_v7  ;;  %v107_v58 = vmul.f32 0.6931472, %v218_v48  ;;  %v61_v59 = vadd.f32 1.0, %v193_v56 }
  0x4a   :  { %219 = vlog2.f32 %v52_v44  ;;  %v114_v61 = vmul.f32 14.0, %v104_v55  ;;  %v56_v63 = vadd.f32 1.0, %v55_v52  ;;  %v64_v0 = vmul.f32 -0.5, %v193_v56 }
  0x4b   :  { %v94_v60 = vmul.f32 0.5, %v92_v53  ;;  %221 = vlog2.f32 %v61_v59  ;;  %v93_v62 = vmul.f32 %v91_v57, %v81_v50  ;;  %v113_v1 = vsel %vm112_vm11, %v110_v54, %v107_v58 }
  0x4c   :  { %v58_v2 = vand.u32 2147483647, %v168_v39  ;;  %v118_v4 = vmul.f32 %v92_v53, %v353_v8  ;;  %v115_v9 = vmul.f32 14.0, %v113_v1  ;;  %v57_v11 = vmul.f32 %v168_v39, %v56_v63 }
  0x4d   :  { %v116_v3 = vsub.f32 %v94_v60, %v114_v61  ;;  %v95_v6 = vmul.f32 0.5, %v93_v62  ;;  %v65_v12 = vadd.f32 1.0, %v64_v0  ;;  %v67_v7 = vand.u32 2147483647, %v193_v56 }
  0x4e   :  { %vm59_vm12 = vcmp.lt.f32.partialorder %v58_v2, 0.0004427343  ;;  %v119_v16 = vmul.f32 %v93_v62, %v355_v10 }
  0x4f   :  { %v120_v14 = vsub.f32 %v118_v4, %v116_v3  ;;  %v117_v15 = vsub.f32 %v95_v6, %v115_v9  ;;  %v66_v18 = vmul.f32 %v193_v56, %v65_v12  ;;  %vm68_vm14 = vcmp.lt.f32.partialorder %v67_v7, 0.0004427343 }
  0x51   :  { %v121_v23 = vsub.f32 %v119_v16, %v117_v15 }
  0x54   :  { %v220_v5 = vpop.eup %219 }
  0x55   :  { %v54_v13 = vmul.f32 0.6931472, %v220_v5  ;;  %v222_v19 = vpop.eup %221 }
  0x56   :  { %v63_v21 = vmul.f32 0.6931472, %v222_v19 }
  0x57   :  { %v60_v17 = vsel %vm59_vm12, %v57_v11, %v54_v13 }
  0x58   :  { %v70_v20 = vmul.f32 14.0, %v60_v17  ;;  %v69_v24 = vsel %vm68_vm14, %v66_v18, %v63_v21 }
  0x59   :  { %v71_v25 = vmul.f32 14.0, %v69_v24 }
  0x5a   :  { %v122_v22 = vsel %vm48_vm13, %v70_v20, %v120_v14 }
  0x5b   :  { %124 = vst [vmem:[#allocation7] sm:$0xff] %v122_v22  ;;  %v123_v26 = vsel %vm49_vm15, %v71_v25, %v121_v23 }
  0x5c   :  { %125 = vst [vmem:[#allocation7 + $0x8] sm:$0xff] %v123_v26 }
  0x5d   :  { %278 = shalt.err (!%p275_p6)
}
  0x5e   :  { %s279_s10 = scalar_lea.hbm %s409_s2, 256 }
  0x5f   :  { %p280_p7 = scmp.ne.s32.totalorder %s409_s2, %s279_s10  ;;  %p283_p8 = scmp.lt.u32.totalorder %s279_s10, %s409_s2 }
  0x61   :  { %p285_p9 = pnand %p283_p8, %p280_p7 }
  0x63   :  { %288 = shalt.err (!%p285_p9)
}
  0x64   :  { %137 = dma.vmem_to_hbm [thread:$0]  %s132_s6, 256, %s409_s2, [#allocation4], %s296_s19, %s296_s19, %s297_s20  }
  0x65   :  { %293 = dma.done.wait [#allocation4], 256  }
  0x66   :  { %294 = vsyncadd [#allocation4], 4294967040 }
  0x67   :  { %141 = vsyncpa [#allocation3], 1 }
  0x68   :  { %142 = vsyncpa [#allocation6], 1 }
  0x69   :  { %143 = vsyncpa [#allocation4], 1 }

</bundles_post_ra>
